<compile_context>
chip_gen: v6e
topology: v6e:2x2x1
jax: 0.10.0
libtpu: 0.0.40
codegen_flags: <defaults>
</compile_context>

<pallas_src>
import jax
import jax.numpy as jnp
from jax.experimental import pallas as pl
from jax.experimental.pallas import tpu as pltpu


def _round_up(x, m):
    return ((x + m - 1) // m) * m


def ensemble_head_kernel(o1_ref, o2_ref, o3_ref, wf1_ref, wf2_ref, wf3_ref, b_ref,
                         logits_ref):
    """One batch tile: logits = [o1|o2|o3] @ W_fused + b_fused (concat fused as 3 dots)."""
    acc = jnp.dot(o1_ref[...], wf1_ref[...], preferred_element_type=jnp.float32)
    acc = acc + jnp.dot(o2_ref[...], wf2_ref[...], preferred_element_type=jnp.float32)
    acc = acc + jnp.dot(o3_ref[...], wf3_ref[...], preferred_element_type=jnp.float32)
    # nn.Dropout(0.1) in eval mode is the identity and the two Linears are folded,
    # so the epilogue is just the (f32) fused bias.
    logits_ref[...] = (acc + b_ref[...]).astype(logits_ref.dtype)


def ensemble_all_forward(o1, o2, o3, w1, b1, w2, b2, *,
                         compute_dtype=jnp.bfloat16,
                         block_b=4096, split_threshold=1024):
    """Forward pass of the EnsembleAll head.

    o1/o2/o3: (B, Hi) backbone outputs.  Weights are stored transposed vs PyTorch,
    i.e. w1: (dim, dim//2), w2: (dim//2, num_labels), so y = x @ W + b.
    """
    B = o1.shape[0]
    H1, H2, H3 = o1.shape[1], o2.shape[1], o3.shape[1]
    dim = H1 + H2 + H3
    half = dim // 2
    num_labels = w2.shape[1]
    assert w1.shape == (dim, half) and w2.shape == (half, num_labels)
    assert b1.shape == (half,) and b2.shape == (num_labels,)

    # --- Algebraic fold of the two Linears (done once, in f32, in the wrapper). ---
    w1f = w1.astype(jnp.float32)
    w2f = w2.astype(jnp.float32)
    w_fused = w1f @ w2f                                              # (dim, num_labels)
    b_fused = (b1.astype(jnp.float32) @ w2f
               + b2.astype(jnp.float32)).reshape(1, num_labels)      # (1, num_labels) f32

    # Row-blocks of the fused weight matched to each backbone output -> the kernel can
    # consume o1/o2/o3 directly (no wrapper-side concat, no extra HBM pass).
    wf1 = w_fused[:H1].astype(compute_dtype)
    wf2 = w_fused[H1:H1 + H2].astype(compute_dtype)
    wf3 = w_fused[H1 + H2:].astype(compute_dtype)

    o1c = o1.astype(compute_dtype)
    o2c = o2.astype(compute_dtype)
    o3c = o3.astype(compute_dtype)

    # --- Batch tiling. ---
    sub = 16 if jnp.dtype(compute_dtype).itemsize == 2 else 8
    if B <= split_threshold:
        tb = B                                    # whole batch, single grid step
    else:
        # >=2 grid steps so ("parallel",) can shard across v7x's two TensorCores;
        # keep the tile a sublane multiple and cap it to amortize per-step overhead.
        tb = min(block_b, _round_up(pl.cdiv(B, 2), sub))
    grid = (pl.cdiv(B, tb),)

    return pl.pallas_call(
        ensemble_head_kernel,
        out_shape=jax.ShapeDtypeStruct((B, num_labels), jnp.float32),
        grid=grid,
        in_specs=[
            pl.BlockSpec((tb, H1), lambda i: (i, 0)),             # o1 (batch-tiled)
            pl.BlockSpec((tb, H2), lambda i: (i, 0)),             # o2 (batch-tiled)
            pl.BlockSpec((tb, H3), lambda i: (i, 0)),             # o3 (batch-tiled)
            pl.BlockSpec((H1, num_labels), lambda i: (0, 0)),     # W_fused rows for o1
            pl.BlockSpec((H2, num_labels), lambda i: (0, 0)),     # W_fused rows for o2
            pl.BlockSpec((H3, num_labels), lambda i: (0, 0)),     # W_fused rows for o3
            pl.BlockSpec((1, num_labels), lambda i: (0, 0)),      # fused bias (f32)
        ],
        out_specs=pl.BlockSpec((tb, num_labels), lambda i: (i, 0)),
        compiler_params=pltpu.CompilerParams(dimension_semantics=("parallel",)),
    )(o1c, o2c, o3c, wf1, wf2, wf3, b_fused)


def _init_linear(key, fan_in, fan_out):
    """Deterministic nn.Linear-style init: U(-1/sqrt(fan_in), 1/sqrt(fan_in))."""
    kw, kb = jax.random.split(key)
    bound = 1.0 / (fan_in ** 0.5)
    w = jax.random.uniform(kw, (fan_in, fan_out), jnp.float32, -bound, bound)
    b = jax.random.uniform(kb, (fan_out,), jnp.float32, -bound, bound)
    return w, b


def _reference(o1, o2, o3, w1, b1, w2, b2):
    """Pure-JAX reference of the PyTorch head (eval-mode dropout = identity)."""
    x = jnp.concatenate([o1, o2, o3], axis=1)
    return (x @ w1 + b1) @ w2 + b2


if __name__ == "__main__":
    key = jax.random.PRNGKey(0)
    k1, k2, k3, kl1, kl2, kb = jax.random.split(key, 6)

    # Small shapes consistent with the module: three backbone hidden sizes.
    B = 2
    H1, H2, H3 = 32, 32, 32          # config1/2/3.hidden_size
    dim = H1 + H2 + H3               # 96
    half = dim // 2                  # 48
    num_labels = 3

    # Backbone outputs (stand-ins for model1/2/3(**input_i)).
    o1 = jax.random.normal(k1, (B, H1), jnp.float32)
    o2 = jax.random.normal(k2, (B, H2), jnp.float32)
    o3 = jax.random.normal(k3, (B, H3), jnp.float32)

    # Head parameters (deterministic init).
    w1, b1 = _init_linear(kl1, dim, half)
    w2, b2 = _init_linear(kl2, half, num_labels)

    ref = _reference(o1, o2, o3, w1, b1, w2, b2)

    # f32-operand path (fold reassociates f32 math -> near-exact).
    logits_f32 = jax.block_until_ready(
        ensemble_all_forward(o1, o2, o3, w1, b1, w2, b2, compute_dtype=jnp.float32))
    assert logits_f32.shape == (B, num_labels)
    assert jnp.allclose(logits_f32, ref, atol=1e-4, rtol=1e-4)

    # Default bf16-operand / f32-accumulate path (MXU fast path, half the DMA bytes).
    logits_bf16 = jax.block_until_ready(
        ensemble_all_forward(o1, o2, o3, w1, b1, w2, b2))
    assert logits_bf16.shape == (B, num_labels)
    assert jnp.allclose(logits_bf16, ref, atol=1e-1, rtol=1e-1)

    # Multi-tile path (forces >=2 grid steps incl. a padded partial tile), f32 exact.
    B2 = 80
    kk1, kk2, kk3 = jax.random.split(kb, 3)
    p1 = jax.random.normal(kk1, (B2, H1), jnp.float32)
    p2 = jax.random.normal(kk2, (B2, H2), jnp.float32)
    p3 = jax.random.normal(kk3, (B2, H3), jnp.float32)
    ref2 = _reference(p1, p2, p3, w1, b1, w2, b2)
    logits_tiled = jax.block_until_ready(
        ensemble_all_forward(p1, p2, p3, w1, b1, w2, b2,
                             compute_dtype=jnp.float32, split_threshold=32))
    assert logits_tiled.shape == (B2, num_labels)
    assert jnp.allclose(logits_tiled, ref2, atol=1e-4, rtol=1e-4)

    print("KERNEL_OK")
</pallas_src>

<mosaic_0001>
module attributes {stable_mosaic.version = 11 : i64} {
  func.func @ensemble_head_kernel(%arg0: i32, %arg1: memref<2x32xf32, #tpu.memory_space<vmem>>, %arg2: memref<2x32xf32, #tpu.memory_space<vmem>>, %arg3: memref<2x32xf32, #tpu.memory_space<vmem>>, %arg4: memref<32x3xf32, #tpu.memory_space<vmem>>, %arg5: memref<32x3xf32, #tpu.memory_space<vmem>>, %arg6: memref<32x3xf32, #tpu.memory_space<vmem>>, %arg7: memref<1x3xf32, #tpu.memory_space<vmem>>, %arg8: memref<2x3xf32, #tpu.memory_space<vmem>>) attributes {dimension_semantics = [#tpu.dimension_semantics<parallel>], iteration_bounds = array<i64: 1>, scalar_prefetch = 0 : i64, scratch_operands = 0 : i64, tpu.core_type = #tpu.core_type<tc>, window_params = [{transform_indices = @transform_0, window_bounds = array<i64: 2, 32>}, {transform_indices = @transform_1, window_bounds = array<i64: 2, 32>}, {transform_indices = @transform_2, window_bounds = array<i64: 2, 32>}, {pipeline_mode = #tpu.pipeline_mode<synchronous>, transform_indices = @transform_3, window_bounds = array<i64: 32, 3>}, {pipeline_mode = #tpu.pipeline_mode<synchronous>, transform_indices = @transform_4, window_bounds = array<i64: 32, 3>}, {pipeline_mode = #tpu.pipeline_mode<synchronous>, transform_indices = @transform_5, window_bounds = array<i64: 32, 3>}, {pipeline_mode = #tpu.pipeline_mode<synchronous>, transform_indices = @transform_6, window_bounds = array<i64: 1, 3>}, {transform_indices = @transform_7, window_bounds = array<i64: 2, 3>}]} {
    %c0 = arith.constant 0 : index
    %c0_0 = arith.constant 0 : index
    %0 = vector.load %arg1[%c0, %c0_0] : memref<2x32xf32, #tpu.memory_space<vmem>>, vector<2x32xf32>
    %c0_1 = arith.constant 0 : index
    %c0_2 = arith.constant 0 : index
    %1 = vector.load %arg4[%c0_1, %c0_2] : memref<32x3xf32, #tpu.memory_space<vmem>>, vector<32x3xf32>
    %cst = arith.constant dense<0.000000e+00> : vector<2x3xf32>
    %2 = tpu.matmul %0, %1, %cst {dimension_numbers = #tpu.dot_dimension_numbers<[1], [0], [0], [1], [0, 0, 1, 1], [], []>} : vector<2x32xf32>, vector<32x3xf32>, vector<2x3xf32> -> vector<2x3xf32>
    %c0_3 = arith.constant 0 : index
    %c0_4 = arith.constant 0 : index
    %3 = vector.load %arg2[%c0_3, %c0_4] : memref<2x32xf32, #tpu.memory_space<vmem>>, vector<2x32xf32>
    %c0_5 = arith.constant 0 : index
    %c0_6 = arith.constant 0 : index
    %4 = vector.load %arg5[%c0_5, %c0_6] : memref<32x3xf32, #tpu.memory_space<vmem>>, vector<32x3xf32>
    %cst_7 = arith.constant dense<0.000000e+00> : vector<2x3xf32>
    %5 = tpu.matmul %3, %4, %cst_7 {dimension_numbers = #tpu.dot_dimension_numbers<[1], [0], [0], [1], [0, 0, 1, 1], [], []>} : vector<2x32xf32>, vector<32x3xf32>, vector<2x3xf32> -> vector<2x3xf32>
    %6 = arith.addf %2, %5 : vector<2x3xf32>
    %c0_8 = arith.constant 0 : index
    %c0_9 = arith.constant 0 : index
    %7 = vector.load %arg3[%c0_8, %c0_9] : memref<2x32xf32, #tpu.memory_space<vmem>>, vector<2x32xf32>
    %c0_10 = arith.constant 0 : index
    %c0_11 = arith.constant 0 : index
    %8 = vector.load %arg6[%c0_10, %c0_11] : memref<32x3xf32, #tpu.memory_space<vmem>>, vector<32x3xf32>
    %cst_12 = arith.constant dense<0.000000e+00> : vector<2x3xf32>
    %9 = tpu.matmul %7, %8, %cst_12 {dimension_numbers = #tpu.dot_dimension_numbers<[1], [0], [0], [1], [0, 0, 1, 1], [], []>} : vector<2x32xf32>, vector<32x3xf32>, vector<2x3xf32> -> vector<2x3xf32>
    %10 = arith.addf %6, %9 : vector<2x3xf32>
    %c0_13 = arith.constant 0 : index
    %c0_14 = arith.constant 0 : index
    %11 = vector.load %arg7[%c0_13, %c0_14] : memref<1x3xf32, #tpu.memory_space<vmem>>, vector<1x3xf32>
    %12 = vector.broadcast %11 : vector<1x3xf32> to vector<2x3xf32>
    %13 = arith.addf %10, %12 : vector<2x3xf32>
    %c0_15 = arith.constant 0 : index
    %c0_16 = arith.constant 0 : index
    %14 = vector.load %arg8[%c0_15, %c0_16] : memref<2x3xf32, #tpu.memory_space<vmem>>, vector<2x3xf32>
    tpu.vector_store %arg8[%c0_15, %c0_16], %13 {strides = array<i32>} : memref<2x3xf32, #tpu.memory_space<vmem>>, vector<2x3xf32>,
    return
  }
  func.func @transform_0(%arg0: i32) -> (i32, i32) {
    %c0_i32 = arith.constant 0 : i32
    %c0_i32_0 = arith.constant 0 : i32
    return %arg0, %c0_i32 : i32, i32
  }
  func.func @transform_1(%arg0: i32) -> (i32, i32) {
    %c0_i32 = arith.constant 0 : i32
    %c0_i32_0 = arith.constant 0 : i32
    return %arg0, %c0_i32 : i32, i32
  }
  func.func @transform_2(%arg0: i32) -> (i32, i32) {
    %c0_i32 = arith.constant 0 : i32
    %c0_i32_0 = arith.constant 0 : i32
    return %arg0, %c0_i32 : i32, i32
  }
  func.func @transform_3(%arg0: i32) -> (i32, i32) {
    %c0_i32 = arith.constant 0 : i32
    %c0_i32_0 = arith.constant 0 : i32
    %c0_i32_1 = arith.constant 0 : i32
    return %c0_i32, %c0_i32_0 : i32, i32
  }
  func.func @transform_4(%arg0: i32) -> (i32, i32) {
    %c0_i32 = arith.constant 0 : i32
    %c0_i32_0 = arith.constant 0 : i32
    %c0_i32_1 = arith.constant 0 : i32
    return %c0_i32, %c0_i32_0 : i32, i32
  }
  func.func @transform_5(%arg0: i32) -> (i32, i32) {
    %c0_i32 = arith.constant 0 : i32
    %c0_i32_0 = arith.constant 0 : i32
    %c0_i32_1 = arith.constant 0 : i32
    return %c0_i32, %c0_i32_0 : i32, i32
  }
  func.func @transform_6(%arg0: i32) -> (i32, i32) {
    %c0_i32 = arith.constant 0 : i32
    %c0_i32_0 = arith.constant 0 : i32
    %c0_i32_1 = arith.constant 0 : i32
    return %c0_i32, %c0_i32_0 : i32, i32
  }
  func.func @transform_7(%arg0: i32) -> (i32, i32) {
    %c0_i32 = arith.constant 0 : i32
    %c0_i32_0 = arith.constant 0 : i32
    return %arg0, %c0_i32 : i32, i32
  }
}

</mosaic_0001>

<bundles_post_ra>
// kernel: tpu_custom_call.1
= control target key start
LH: loop header
LB: loop body
LE: loop exit
PB: predicated region body
PF: predicated region fallthrough
CT: control target
= control target key end

     0   :  { %v364_v2 = vmov 0.0   ;;  %s461_s0 = inlined_call_operand.vmem [shape: f32[2,32], index: 0, kind: input, shape index: {}]   ;;  %s462_s1 = inlined_call_operand.vmem [shape: f32[2,32], index: 1, kind: input, shape index: {}]   ;;  %s463_s2 = inlined_call_operand.vmem [shape: f32[2,32], index: 2, kind: input, shape index: {}]   ;;  %s464_s3 = inlined_call_operand.vmem [shape: f32[32,3], index: 3, kind: input, shape index: {}]   ;;  %s465_s4 = inlined_call_operand.vmem [shape: f32[32,3], index: 4, kind: input, shape index: {}]   ;;  %s466_s5 = inlined_call_operand.vmem [shape: f32[32,3], index: 5, kind: input, shape index: {}]   ;;  %s467_s6 = inlined_call_operand.vmem [shape: f32[1,3], index: 6, kind: input, shape index: {}]   ;;  %s468_s7 = inlined_call_operand.hbm [shape: f32[2,3], index: 7, kind: output, shape index: {}]  }
   0x1   :  { %v36_v0 = vld [vmem:[%s465_s4 + $0x18] sm:$0xff]  ;;  %306 = vmatprep.subr.mxu0 %v364_v2  ;;  %317 = vmatprep.subr.mxu1 %v364_v2  ;;  %v35_v3 = vld [vmem:[%s465_s4 + $0x10] sm:$0xff]  ;;  %v34_v5 = vld [vmem:[%s465_s4 + $0x8] sm:$0xff] }
   0x2   :  { %v31_v1 = vld [vmem:[%s464_s3 + $0x18] sm:$0xff]  ;;  %v30_v4 = vld [vmem:[%s464_s3 + $0x10] sm:$0xff]  ;;  %307 = vmatpush3.msra.mxu0 %v36_v0  ;;  %v29_v6 = vld [vmem:[%s464_s3 + $0x8] sm:$0xff] }
   0x3   :  { %318 = vmatpush3.msra.mxu1 %v31_v1  ;;  %308 = vmatprep.subr.mxu0 %v364_v2  ;;  %v33_v7 = vld [vmem:[%s465_s4] sm:$0xff] }
   0x4   :  { %319 = vmatprep.subr.mxu1 %v364_v2  ;;  %309 = vmatpush3.msra.mxu0 %v35_v3 }
   0x5   :  { %320 = vmatpush3.msra.mxu1 %v30_v4  ;;  %310 = vmatprep.subr.mxu0 %v364_v2 }
   0x6   :  { %321 = vmatprep.subr.mxu1 %v364_v2 }
   0x7   :  { %12 = vsyncpa [#allocation3], 0  ;;  %311 = vmatpush3.msra.mxu0 %v34_v5  ;;  %322 = vmatpush3.msra.mxu1 %v29_v6  ;;  %v32_v8 = vld [vmem:[%s462_s1] sm:$0x3]  ;;  %vm37_vm0 = vcmask 261120   ;;  %vm365_vm1 = vmmov 0  }
   0x8   :  { %v28_v9 = vld [vmem:[%s464_s3] sm:$0xff]  ;;  %312 = vmatprep.subr.mxu0 %v364_v2  ;;  %314 = vmatprep.mubr.msk.f32.mxu0 %vm365_vm1, %v364_v2  ;;  %v188_v11 = vld [vmem:[%s466_s5 + $0x18] sm:$0xff]  ;;  %v187_v12 = vld [vmem:[%s466_s5 + $0x10] sm:$0xff]  ;;  %vm271_vm2 = vcmask 17408  }
   0x9   :  { %313 = vmatpush3.msra.mxu0 %v33_v7  ;;  %323 = vmatprep.subr.mxu1 %v364_v2  ;;  %v27_v10 = vld [vmem:[%s461_s0] sm:$0x3]  ;;  %v186_v13 = vld [vmem:[%s466_s5 + $0x8] sm:$0xff] }
   0xa   :  { %315 = vmatmul.mubr.msk.f32.vlgmr.msra.gmra.mxu0 %vm37_vm0, %v32_v8  ;;  %324 = vmatpush3.msra.mxu1 %v28_v9  ;;  %v185_v14 = vld [vmem:[%s466_s5] sm:$0xff]  ;;  %s366_s5 = smov [#allocation2]  }
   0xb   :  { %325 = vmatprep.mubr.msk.f32.mxu1 %vm365_vm1, %v364_v2  ;;  %328 = vmatprep.subr.mxu0 %v364_v2  ;;  %v184_v15 = vld [vmem:[%s463_s2] sm:$0x3]  ;;  %s279_s29 = sshll.u32 %s366_s5, 4  ;;  %s280_s29 = int_to_ptr.vmem [resolvable:$true] %s279_s29 }
   0xc   :  { %326 = vmatmul.mubr.msk.f32.vlgmr.msra.gmra.mxu1 %vm37_vm0, %v27_v10  ;;  %329 = vmatpush3.msra.mxu0 %v188_v11  ;;  %v290_v22 = vld [vmem:[%s467_s6] ss:$0 sm:$0xff]  ;;  %s342_s2 = scalar_lea.vmem %s280_s29, 32  ;;  %p347_p1 = scmp.lt.s32.totalorder %s280_s29, %s280_s29 }
   0xd   :  { %330 = vmatprep.subr.mxu0 %v364_v2  ;;  %336 = vmatprep.mubr.msk.f32.mxu0 %vm365_vm1, %v364_v2  ;;  %p343_p0 = scmp.ne.s32.totalorder %s280_s29, %s342_s2  ;;  %p348_p2 = scmp.lt.s32.totalorder %s342_s2, %s342_s2 }
   0xe   :  { %331 = vmatpush3.msra.mxu0 %v187_v12 }
   0xf   :  { %332 = vmatprep.subr.mxu0 %v364_v2  ;;  %p349_p3 = por %p348_p2, %p347_p1 }
  0x10   :  { %333 = vmatpush3.msra.mxu0 %v186_v13 }
  0x11   :  { %334 = vmatprep.subr.mxu0 %v364_v2  ;;  %p350_p4 = pnand %p349_p3, %p343_p0 }
  0x12   :  { %335 = vmatpush3.msra.mxu0 %v185_v14 }
  0x13   :  { %337 = vmatmul.mubr.msk.f32.vlgmr.msra.gmra.mxu0 %vm37_vm0, %v184_v15 }
  0xca   :  { %v107_v16 = vpop.f32.mrf.mxu0 }
  0xcc   :  { %v180_v17 = vpop.f32.mrf.mxu1  ;;  %v316_v18 = vpop.f32.mrf.mxu0 }
  0xcd   :  { %v181_v20 = vadd.f32 %v180_v17, %v107_v16 }
  0xce   :  { %v327_v19 = vpop.f32.mrf.mxu1 }
  0xd3   :  { %v258_v21 = vpop.f32.mrf.mxu0 }
  0xd4   :  { %v262_v23 = vadd.f32 %v258_v21, %v181_v20 }
  0xd5   :  { %v338_v24 = vpop.f32.mrf.mxu0 }
  0xd6   :  { %v270_v25 = vadd.f32 %v290_v22, %v262_v23 }
  0xd8   :  { %272 = vst.msk [vmem:[#allocation2] sm:$0x3] %vm271_vm2, %v270_v25 }
  0xd9   :  { %353 = shalt.err (!%p350_p4)
}
  0xda   :  { %282 = dma.vmem_to_hbm [thread:$0]  %s280_s29, 32, %s468_s7, [#allocation3]  }
  0xdb   :  { %362 = dma.done.wait [#allocation3], 32  }
  0xdc   :  { %363 = vsyncadd [#allocation3], 4294967264 }
  0xdd   :  { %286 = vsyncpa [#allocation3], 1 }

</bundles_post_ra>
